<compile_context>
chip_gen: v5e
topology: v5e:2x2
jax: 0.10.0
libtpu: 0.0.40
codegen_flags: <defaults>
</compile_context>

<pallas_src>
import functools

import jax
import jax.numpy as jnp
from jax.experimental import pallas as pl
from jax.experimental.pallas import tpu as pltpu


# ----------------------------------------------------------------------------
# Kernel
# ----------------------------------------------------------------------------
def _bn_relu_f32(h, gamma, beta, eps=1e-5):
    """Training-mode BatchNorm1d (biased batch variance) + ReLU, in f32."""
    mean = jnp.mean(h, axis=0, keepdims=True)
    var = jnp.mean(jnp.square(h - mean), axis=0, keepdims=True)  # two-pass: stable
    hn = (h - mean) * jax.lax.rsqrt(var + eps)
    return jnp.maximum(hn * gamma + beta, 0.0)


def decoder_kernel(
    x_ref,
    w1_ref, g1_ref, be1_ref,
    w2_ref, g2_ref, be2_ref,
    w3_ref, g3_ref, be3_ref,
    w4_ref, b4_ref,
    out_ref,
    h3_ref,  # VMEM scratch, persists across the fc4-tile grid
):
    # Head: computed once (grid axis is "arbitrary", so step 0 runs first).
    @pl.when(pl.program_id(0) == 0)
    def _():
        xb = x_ref[...].astype(jnp.bfloat16)          # in-kernel cast (VPU, hidden)
        h = jnp.dot(xb, w1_ref[...], preferred_element_type=jnp.float32)
        h = _bn_relu_f32(h, g1_ref[...], be1_ref[...])
        h = jnp.dot(h.astype(jnp.bfloat16), w2_ref[...],
                    preferred_element_type=jnp.float32)
        h = _bn_relu_f32(h, g2_ref[...], be2_ref[...])
        h = jnp.dot(h.astype(jnp.bfloat16), w3_ref[...],
                    preferred_element_type=jnp.float32)
        h = _bn_relu_f32(h, g3_ref[...], be3_ref[...])
        h3_ref[...] = h.astype(h3_ref.dtype)

    # fc4 column tile + tanh (W4 tile DMA pipelined by BlockSpec machinery).
    acc = jnp.dot(h3_ref[...], w4_ref[...], preferred_element_type=jnp.float32)
    out_ref[...] = jnp.tanh(acc + b4_ref[...])


# ----------------------------------------------------------------------------
# Generation-aware sizing helpers
# ----------------------------------------------------------------------------
def _device_kind():
    try:
        return jax.devices()[0].device_kind.lower()
    except Exception:
        return ""


def _max_tile_for(kind):
    # v7x (~3.2 TB/s): need big tiles to amortize ~0.35us/step overhead.
    if "v7" in kind:
        return 8192
    if "v6" in kind:
        return 4096
    return 2048  # v5e / unknown: 1 MiB tile DMA already >> step overhead


def _vmem_capacity_bytes(kind):
    try:
        return int(pltpu.get_tpu_info().vmem_capacity_bytes)
    except Exception:
        return (64 << 20) if "v7" in kind else (128 << 20)


def _vmem_limit_bytes(kind, needed_bytes):
    cap = _vmem_capacity_bytes(kind)
    cap = min(max(cap, 64 << 20), 128 << 20)   # sanity clamp
    hard_cap = int(cap * 0.85)                 # leave Mosaic internal-scratch headroom
    want = int(needed_bytes * 1.25) + (4 << 20)
    return min(max(want, 16 << 20), hard_cap)


def _pick_tile_n(out_padded, max_tile):
    """fc4 output-column tile; out_padded is a multiple of 256."""
    if out_padded <= max_tile:
        return out_padded
    t = max(256, (max_tile // 256) * 256)
    while out_padded % t:
        t -= 256
    return t


def _nbytes(*arrays):
    return sum(int(a.size) * a.dtype.itemsize for a in arrays)


def _round_up(n, m):
    return ((n + m - 1) // m) * m


# ----------------------------------------------------------------------------
# Wrapper
# ----------------------------------------------------------------------------
def decoder_forward(x, packed, num_points, max_tile=None):
    """x: (B, bottleneck) f32 -> (B, num_points, 3) f32."""
    (w1, g1, be1, w2, g2, be2, w3, g3, be3, w4, b4) = packed
    B, bn = x.shape
    k4p = w4.shape[0]           # padded bottleneck // 4 (multiple of 128)
    outp = w4.shape[1]          # padded 3 * num_points (multiple of 256, point-major)
    out_feats = 3 * num_points

    kind = _device_kind()
    if max_tile is None:
        max_tile = _max_tile_for(kind)
    tile_n = _pick_tile_n(outp, max(256, max_tile))
    grid = (outp // tile_n,)

    full_inputs = (x, w1, g1, be1, w2, g2, be2, w3, g3, be3)
    in_specs = [pl.BlockSpec(a.shape, lambda j: (0, 0)) for a in full_inputs]
    in_specs += [
        pl.BlockSpec((k4p, tile_n), lambda j: (0, j)),   # W4 column tile
        pl.BlockSpec((1, tile_n), lambda j: (0, j)),     # b4 column tile
    ]
    out_spec = pl.BlockSpec((B, tile_n), lambda j: (0, j))

    # VMEM budget: resident inputs (x2 for buffering), double-buffered W4/b4/out
    # tiles, live f32+bf16 head activations, and the h3 scratch.
    resident_bytes = _nbytes(*full_inputs)
    tile_bytes = k4p * tile_n * 2 + tile_n * 4 + B * tile_n * 4
    act_bytes = B * (bn + bn // 2 + k4p) * 6
    scratch_bytes = B * k4p * 2
    needed = 2 * resident_bytes + 2 * tile_bytes + act_bytes + scratch_bytes

    flops = 2 * B * (w1.shape[0] * w1.shape[1]
                     + w2.shape[0] * w2.shape[1]
                     + w3.shape[0] * w3.shape[1]
                     + k4p * outp)
    bytes_accessed = _nbytes(*full_inputs, w4, b4) + B * outp * 4

    out_flat = pl.pallas_call(
        decoder_kernel,
        out_shape=jax.ShapeDtypeStruct((B, outp), jnp.float32),
        grid=grid,
        in_specs=in_specs,
        out_specs=out_spec,
        scratch_shapes=[pltpu.VMEM((B, k4p), jnp.bfloat16)],
        compiler_params=pltpu.CompilerParams(
            # "arbitrary": h3 scratch is written at step 0 and read by later
            # tiles, so the fc4-tile axis must run sequentially.
            dimension_semantics=("arbitrary",),
            vmem_limit_bytes=_vmem_limit_bytes(kind, needed)),
        cost_estimate=pl.CostEstimate(
            flops=flops, transcendentals=B * outp,
            bytes_accessed=bytes_accessed),
    )(*full_inputs, w4, b4)

    if outp != out_feats:
        out_flat = out_flat[:, :out_feats]
    # Columns were permuted into point-major order, so this reshape is free.
    return out_flat.reshape(B, num_points, 3)


# ----------------------------------------------------------------------------
# Parameters
# ----------------------------------------------------------------------------
def init_params(key, bottleneck_size, num_points):
    """Torch-equivalent synthetic parameters, weights stored as (in, out)."""
    dims = [
        (bottleneck_size, bottleneck_size),              # fc1
        (bottleneck_size, bottleneck_size // 2),         # fc2
        (bottleneck_size // 2, bottleneck_size // 4),    # fc3
        (bottleneck_size // 4, num_points * 3),          # fc4
    ]
    params = []
    keys = jax.random.split(key, 8)
    ki = 0
    for li, (fin, fout) in enumerate(dims):
        bound = 1.0 / jnp.sqrt(fin)
        w = jax.random.uniform(keys[ki], (fin, fout), jnp.float32, -bound, bound)
        ki += 1
        b = jax.random.uniform(keys[ki], (1, fout), jnp.float32, -bound, bound)
        ki += 1
        params.extend([w, b])
        if li < 3:  # BN after fc1..fc3 only (torch default init: gamma=1, beta=0)
            params.extend([jnp.ones((1, fout), jnp.float32),
                           jnp.zeros((1, fout), jnp.float32)])
    return params


def pack_params(params, num_points):
    """One-time repack: bf16 weights, drop BN-cancelled biases, fold the final
    transpose into a W4/b4 column permutation, pad k4 to a multiple of 128 and
    fc4 output columns to a multiple of 256 (lane-dense, no ragged tiles)."""
    (w1, _b1, g1, be1, w2, _b2, g2, be2, w3, _b3, g3, be3, w4, b4) = params
    k4 = w3.shape[1]
    out_feats = w4.shape[1]  # 3 * num_points

    # Fold view(B,3,P).transpose(1,2): new column p*3+c <- old column c*P+p.
    p = jnp.arange(num_points)[:, None]
    c = jnp.arange(3)[None, :]
    perm = (c * num_points + p).reshape(-1)
    w4p = w4[:, perm]
    b4p = b4[:, perm]

    # Pad k4 (fc3 out / fc4 in). gamma=0, beta=0 on padded columns => exactly 0.
    pad_k = _round_up(k4, 128) - k4
    if pad_k:
        w3 = jnp.pad(w3, ((0, 0), (0, pad_k)))
        g3 = jnp.pad(g3, ((0, 0), (0, pad_k)))
        be3 = jnp.pad(be3, ((0, 0), (0, pad_k)))
        w4p = jnp.pad(w4p, ((0, pad_k), (0, 0)))

    # Pad fc4 output columns; tanh(0+0)=0 in padding, sliced off in the wrapper.
    pad_n = _round_up(out_feats, 256) - out_feats
    if pad_n:
        w4p = jnp.pad(w4p, ((0, 0), (0, pad_n)))
        b4p = jnp.pad(b4p, ((0, 0), (0, pad_n)))

    bf = jnp.bfloat16
    return (w1.astype(bf), g1, be1,
            w2.astype(bf), g2, be2,
            w3.astype(bf), g3, be3,
            w4p.astype(bf), b4p)


# ----------------------------------------------------------------------------
# Pure-JAX reference (torch-faithful structure, bf16 matmul operands)
# ----------------------------------------------------------------------------
def reference_forward(x, params, num_points):
    (w1, b1, g1, be1, w2, b2, g2, be2, w3, b3, g3, be3, w4, b4) = params

    def lin(h, w, b):
        return jnp.dot(h.astype(jnp.bfloat16), w.astype(jnp.bfloat16),
                       preferred_element_type=jnp.float32) + b

    def bn_relu(h, g, be, eps=1e-5):
        m = jnp.mean(h, axis=0, keepdims=True)
        v = jnp.mean((h - m) ** 2, axis=0, keepdims=True)
        return jnp.maximum((h - m) * jax.lax.rsqrt(v + eps) * g + be, 0.0)

    h = bn_relu(lin(x, w1, b1), g1, be1)
    h = bn_relu(lin(h, w2, b2), g2, be2)
    h = bn_relu(lin(h, w3, b3), g3, be3)
    h = jnp.tanh(lin(h, w4, b4))
    return jnp.transpose(h.reshape(-1, 3, num_points), (0, 2, 1))


# ----------------------------------------------------------------------------
if __name__ == "__main__":
    key = jax.random.PRNGKey(0)

    def run_case(batch, bottleneck_size, num_points, max_tile=None):
        kx, kp = jax.random.split(jax.random.fold_in(key, num_points))
        x = jax.random.normal(kx, (batch, bottleneck_size), jnp.float32)
        params = init_params(kp, bottleneck_size, num_points)
        packed = pack_params(params, num_points)
        fwd = jax.jit(functools.partial(decoder_forward, num_points=num_points,
                                        max_tile=max_tile))
        out = fwd(x, packed)
        jax.block_until_ready(out)
        assert out.shape == (batch, num_points, 3), out.shape
        assert out.dtype == jnp.float32
        assert bool(jnp.all(jnp.isfinite(out)))
        assert bool(jnp.all(jnp.abs(out) <= 1.0))  # tanh range
        ref = reference_forward(x, params, num_points)
        max_err = float(jnp.max(jnp.abs(out - ref)))
        assert max_err < 5e-2, f"max abs err vs reference: {max_err}"

    # Small demo shapes consistent with the module (batch multiple of 8).
    run_case(batch=8, bottleneck_size=32, num_points=8)
    # Forced small tile: exercises the multi-tile grid + scratch-carry path.
    run_case(batch=8, bottleneck_size=32, num_points=256, max_tile=256)

    print("KERNEL_OK")
</pallas_src>

<mosaic_0001>
module attributes {stable_mosaic.version = 11 : i64} {
  func.func @decoder_kernel(%arg0: i32, %arg1: memref<8x32xf32, #tpu.memory_space<vmem>>, %arg2: memref<32x32xbf16, #tpu.memory_space<vmem>>, %arg3: memref<1x32xf32, #tpu.memory_space<vmem>>, %arg4: memref<1x32xf32, #tpu.memory_space<vmem>>, %arg5: memref<32x16xbf16, #tpu.memory_space<vmem>>, %arg6: memref<1x16xf32, #tpu.memory_space<vmem>>, %arg7: memref<1x16xf32, #tpu.memory_space<vmem>>, %arg8: memref<16x128xbf16, #tpu.memory_space<vmem>>, %arg9: memref<1x128xf32, #tpu.memory_space<vmem>>, %arg10: memref<1x128xf32, #tpu.memory_space<vmem>>, %arg11: memref<128x256xbf16, #tpu.memory_space<vmem>>, %arg12: memref<1x256xf32, #tpu.memory_space<vmem>>, %arg13: memref<8x256xf32, #tpu.memory_space<vmem>>, %arg14: memref<8x128xbf16, #tpu.memory_space<vmem>>) attributes {dimension_semantics = [#tpu.dimension_semantics<arbitrary>], iteration_bounds = array<i64: 1>, scalar_prefetch = 0 : i64, scratch_operands = 1 : i64, tpu.core_type = #tpu.core_type<tc>, window_params = [{pipeline_mode = #tpu.pipeline_mode<synchronous>, transform_indices = @transform_0, window_bounds = array<i64: 8, 32>}, {pipeline_mode = #tpu.pipeline_mode<synchronous>, transform_indices = @transform_1, window_bounds = array<i64: 32, 32>}, {pipeline_mode = #tpu.pipeline_mode<synchronous>, transform_indices = @transform_2, window_bounds = array<i64: 1, 32>}, {pipeline_mode = #tpu.pipeline_mode<synchronous>, transform_indices = @transform_3, window_bounds = array<i64: 1, 32>}, {pipeline_mode = #tpu.pipeline_mode<synchronous>, transform_indices = @transform_4, window_bounds = array<i64: 32, 16>}, {pipeline_mode = #tpu.pipeline_mode<synchronous>, transform_indices = @transform_5, window_bounds = array<i64: 1, 16>}, {pipeline_mode = #tpu.pipeline_mode<synchronous>, transform_indices = @transform_6, window_bounds = array<i64: 1, 16>}, {pipeline_mode = #tpu.pipeline_mode<synchronous>, transform_indices = @transform_7, window_bounds = array<i64: 16, 128>}, {pipeline_mode = #tpu.pipeline_mode<synchronous>, transform_indices = @transform_8, window_bounds = array<i64: 1, 128>}, {pipeline_mode = #tpu.pipeline_mode<synchronous>, transform_indices = @transform_9, window_bounds = array<i64: 1, 128>}, {transform_indices = @transform_10, window_bounds = array<i64: 128, 256>}, {transform_indices = @transform_11, window_bounds = array<i64: 1, 256>}, {transform_indices = @transform_12, window_bounds = array<i64: 8, 256>}]} {
    %c0_i32 = arith.constant 0 : i32
    %0 = arith.cmpi eq, %arg0, %c0_i32 : i32
    %1 = arith.extui %0 : i1 to i32
    %c0_i32_0 = arith.constant 0 : i32
    %2 = arith.cmpi ne, %1, %c0_i32_0 : i32
    scf.if %2 {
      %c0_8 = arith.constant 0 : index
      %c0_9 = arith.constant 0 : index
      %11 = vector.load %arg1[%c0_8, %c0_9] : memref<8x32xf32, #tpu.memory_space<vmem>>, vector<8x32xf32>
      %12 = arith.truncf %11 : vector<8x32xf32> to vector<8x32xbf16>
      %c0_10 = arith.constant 0 : index
      %c0_11 = arith.constant 0 : index
      %13 = vector.load %arg2[%c0_10, %c0_11] : memref<32x32xbf16, #tpu.memory_space<vmem>>, vector<32x32xbf16>
      %cst_12 = arith.constant dense<0.000000e+00> : vector<8x32xf32>
      %14 = tpu.matmul %12, %13, %cst_12 {dimension_numbers = #tpu.dot_dimension_numbers<[1], [0], [0], [1], [0, 0, 1, 1], [], []>} : vector<8x32xbf16>, vector<32x32xbf16>, vector<8x32xf32> -> vector<8x32xf32>
      %c0_13 = arith.constant 0 : index
      %c0_14 = arith.constant 0 : index
      %15 = vector.load %arg3[%c0_13, %c0_14] : memref<1x32xf32, #tpu.memory_space<vmem>>, vector<1x32xf32>
      %c0_15 = arith.constant 0 : index
      %c0_16 = arith.constant 0 : index
      %16 = vector.load %arg4[%c0_15, %c0_16] : memref<1x32xf32, #tpu.memory_space<vmem>>, vector<1x32xf32>
      %cst_17 = arith.constant dense<0.000000e+00> : vector<32xf32>
      %17 = vector.multi_reduction <add>, %14, %cst_17 [0] : vector<8x32xf32> to vector<32xf32>
      %18 = vector.shape_cast %17 : vector<32xf32> to vector<1x32xf32>
      %cst_18 = arith.constant 8.000000e+00 : f32
      %19 = vector.broadcast %cst_18 : f32 to vector<1x32xf32>
      %20 = arith.divf %18, %19 : vector<1x32xf32>
      %21 = vector.broadcast %20 : vector<1x32xf32> to vector<8x32xf32>
      %22 = arith.subf %14, %21 : vector<8x32xf32>
      %23 = arith.mulf %22, %22 : vector<8x32xf32>
      %cst_19 = arith.constant dense<0.000000e+00> : vector<32xf32>
      %24 = vector.multi_reduction <add>, %23, %cst_19 [0] : vector<8x32xf32> to vector<32xf32>
      %25 = vector.shape_cast %24 : vector<32xf32> to vector<1x32xf32>
      %cst_20 = arith.constant 8.000000e+00 : f32
      %26 = vector.broadcast %cst_20 : f32 to vector<1x32xf32>
      %27 = arith.divf %25, %26 : vector<1x32xf32>
      %28 = vector.broadcast %20 : vector<1x32xf32> to vector<8x32xf32>
      %29 = arith.subf %14, %28 : vector<8x32xf32>
      %cst_21 = arith.constant 9.99999974E-6 : f32
      %30 = vector.broadcast %cst_21 : f32 to vector<1x32xf32>
      %31 = arith.addf %27, %30 : vector<1x32xf32>
      %32 = math.rsqrt %31 : vector<1x32xf32>
      %33 = vector.broadcast %32 : vector<1x32xf32> to vector<8x32xf32>
      %34 = arith.mulf %29, %33 : vector<8x32xf32>
      %35 = vector.broadcast %15 : vector<1x32xf32> to vector<8x32xf32>
      %36 = arith.mulf %34, %35 : vector<8x32xf32>
      %37 = vector.broadcast %16 : vector<1x32xf32> to vector<8x32xf32>
      %38 = arith.addf %36, %37 : vector<8x32xf32>
      %cst_22 = arith.constant 0.000000e+00 : f32
      %39 = vector.broadcast %cst_22 : f32 to vector<8x32xf32>
      %40 = arith.maximumf %38, %39 : vector<8x32xf32>
      %41 = arith.truncf %40 : vector<8x32xf32> to vector<8x32xbf16>
      %c0_23 = arith.constant 0 : index
      %c0_24 = arith.constant 0 : index
      %42 = vector.load %arg5[%c0_23, %c0_24] : memref<32x16xbf16, #tpu.memory_space<vmem>>, vector<32x16xbf16>
      %cst_25 = arith.constant dense<0.000000e+00> : vector<8x16xf32>
      %43 = tpu.matmul %41, %42, %cst_25 {dimension_numbers = #tpu.dot_dimension_numbers<[1], [0], [0], [1], [0, 0, 1, 1], [], []>} : vector<8x32xbf16>, vector<32x16xbf16>, vector<8x16xf32> -> vector<8x16xf32>
      %c0_26 = arith.constant 0 : index
      %c0_27 = arith.constant 0 : index
      %44 = vector.load %arg6[%c0_26, %c0_27] : memref<1x16xf32, #tpu.memory_space<vmem>>, vector<1x16xf32>
      %c0_28 = arith.constant 0 : index
      %c0_29 = arith.constant 0 : index
      %45 = vector.load %arg7[%c0_28, %c0_29] : memref<1x16xf32, #tpu.memory_space<vmem>>, vector<1x16xf32>
      %cst_30 = arith.constant dense<0.000000e+00> : vector<16xf32>
      %46 = vector.multi_reduction <add>, %43, %cst_30 [0] : vector<8x16xf32> to vector<16xf32>
      %47 = vector.shape_cast %46 : vector<16xf32> to vector<1x16xf32>
      %cst_31 = arith.constant 8.000000e+00 : f32
      %48 = vector.broadcast %cst_31 : f32 to vector<1x16xf32>
      %49 = arith.divf %47, %48 : vector<1x16xf32>
      %50 = vector.broadcast %49 : vector<1x16xf32> to vector<8x16xf32>
      %51 = arith.subf %43, %50 : vector<8x16xf32>
      %52 = arith.mulf %51, %51 : vector<8x16xf32>
      %cst_32 = arith.constant dense<0.000000e+00> : vector<16xf32>
      %53 = vector.multi_reduction <add>, %52, %cst_32 [0] : vector<8x16xf32> to vector<16xf32>
      %54 = vector.shape_cast %53 : vector<16xf32> to vector<1x16xf32>
      %cst_33 = arith.constant 8.000000e+00 : f32
      %55 = vector.broadcast %cst_33 : f32 to vector<1x16xf32>
      %56 = arith.divf %54, %55 : vector<1x16xf32>
      %57 = vector.broadcast %49 : vector<1x16xf32> to vector<8x16xf32>
      %58 = arith.subf %43, %57 : vector<8x16xf32>
      %cst_34 = arith.constant 9.99999974E-6 : f32
      %59 = vector.broadcast %cst_34 : f32 to vector<1x16xf32>
      %60 = arith.addf %56, %59 : vector<1x16xf32>
      %61 = math.rsqrt %60 : vector<1x16xf32>
      %62 = vector.broadcast %61 : vector<1x16xf32> to vector<8x16xf32>
      %63 = arith.mulf %58, %62 : vector<8x16xf32>
      %64 = vector.broadcast %44 : vector<1x16xf32> to vector<8x16xf32>
      %65 = arith.mulf %63, %64 : vector<8x16xf32>
      %66 = vector.broadcast %45 : vector<1x16xf32> to vector<8x16xf32>
      %67 = arith.addf %65, %66 : vector<8x16xf32>
      %cst_35 = arith.constant 0.000000e+00 : f32
      %68 = vector.broadcast %cst_35 : f32 to vector<8x16xf32>
      %69 = arith.maximumf %67, %68 : vector<8x16xf32>
      %70 = arith.truncf %69 : vector<8x16xf32> to vector<8x16xbf16>
      %c0_36 = arith.constant 0 : index
      %c0_37 = arith.constant 0 : index
      %71 = vector.load %arg8[%c0_36, %c0_37] : memref<16x128xbf16, #tpu.memory_space<vmem>>, vector<16x128xbf16>
      %cst_38 = arith.constant dense<0.000000e+00> : vector<8x128xf32>
      %72 = tpu.matmul %70, %71, %cst_38 {dimension_numbers = #tpu.dot_dimension_numbers<[1], [0], [0], [1], [0, 0, 1, 1], [], []>} : vector<8x16xbf16>, vector<16x128xbf16>, vector<8x128xf32> -> vector<8x128xf32>
      %c0_39 = arith.constant 0 : index
      %c0_40 = arith.constant 0 : index
      %73 = vector.load %arg9[%c0_39, %c0_40] : memref<1x128xf32, #tpu.memory_space<vmem>>, vector<1x128xf32>
      %c0_41 = arith.constant 0 : index
      %c0_42 = arith.constant 0 : index
      %74 = vector.load %arg10[%c0_41, %c0_42] : memref<1x128xf32, #tpu.memory_space<vmem>>, vector<1x128xf32>
      %cst_43 = arith.constant dense<0.000000e+00> : vector<128xf32>
      %75 = vector.multi_reduction <add>, %72, %cst_43 [0] : vector<8x128xf32> to vector<128xf32>
      %76 = vector.shape_cast %75 : vector<128xf32> to vector<1x128xf32>
      %cst_44 = arith.constant 8.000000e+00 : f32
      %77 = vector.broadcast %cst_44 : f32 to vector<1x128xf32>
      %78 = arith.divf %76, %77 : vector<1x128xf32>
      %79 = vector.broadcast %78 : vector<1x128xf32> to vector<8x128xf32>
      %80 = arith.subf %72, %79 : vector<8x128xf32>
      %81 = arith.mulf %80, %80 : vector<8x128xf32>
      %cst_45 = arith.constant dense<0.000000e+00> : vector<128xf32>
      %82 = vector.multi_reduction <add>, %81, %cst_45 [0] : vector<8x128xf32> to vector<128xf32>
      %83 = vector.shape_cast %82 : vector<128xf32> to vector<1x128xf32>
      %cst_46 = arith.constant 8.000000e+00 : f32
      %84 = vector.broadcast %cst_46 : f32 to vector<1x128xf32>
      %85 = arith.divf %83, %84 : vector<1x128xf32>
      %86 = vector.broadcast %78 : vector<1x128xf32> to vector<8x128xf32>
      %87 = arith.subf %72, %86 : vector<8x128xf32>
      %cst_47 = arith.constant 9.99999974E-6 : f32
      %88 = vector.broadcast %cst_47 : f32 to vector<1x128xf32>
      %89 = arith.addf %85, %88 : vector<1x128xf32>
      %90 = math.rsqrt %89 : vector<1x128xf32>
      %91 = vector.broadcast %90 : vector<1x128xf32> to vector<8x128xf32>
      %92 = arith.mulf %87, %91 : vector<8x128xf32>
      %93 = vector.broadcast %73 : vector<1x128xf32> to vector<8x128xf32>
      %94 = arith.mulf %92, %93 : vector<8x128xf32>
      %95 = vector.broadcast %74 : vector<1x128xf32> to vector<8x128xf32>
      %96 = arith.addf %94, %95 : vector<8x128xf32>
      %cst_48 = arith.constant 0.000000e+00 : f32
      %97 = vector.broadcast %cst_48 : f32 to vector<8x128xf32>
      %98 = arith.maximumf %96, %97 : vector<8x128xf32>
      %99 = arith.truncf %98 : vector<8x128xf32> to vector<8x128xbf16>
      %c0_49 = arith.constant 0 : index
      %c0_50 = arith.constant 0 : index
      %100 = vector.load %arg14[%c0_49, %c0_50] : memref<8x128xbf16, #tpu.memory_space<vmem>>, vector<8x128xbf16>
      tpu.vector_store %arg14[%c0_49, %c0_50], %99 {strides = array<i32>} : memref<8x128xbf16, #tpu.memory_space<vmem>>, vector<8x128xbf16>,
    } else {
    }
    %c0 = arith.constant 0 : index
    %c0_1 = arith.constant 0 : index
    %3 = vector.load %arg14[%c0, %c0_1] : memref<8x128xbf16, #tpu.memory_space<vmem>>, vector<8x128xbf16>
    %c0_2 = arith.constant 0 : index
    %c0_3 = arith.constant 0 : index
    %4 = vector.load %arg11[%c0_2, %c0_3] : memref<128x256xbf16, #tpu.memory_space<vmem>>, vector<128x256xbf16>
    %cst = arith.constant dense<0.000000e+00> : vector<8x256xf32>
    %5 = tpu.matmul %3, %4, %cst {dimension_numbers = #tpu.dot_dimension_numbers<[1], [0], [0], [1], [0, 0, 1, 1], [], []>} : vector<8x128xbf16>, vector<128x256xbf16>, vector<8x256xf32> -> vector<8x256xf32>
    %c0_4 = arith.constant 0 : index
    %c0_5 = arith.constant 0 : index
    %6 = vector.load %arg12[%c0_4, %c0_5] : memref<1x256xf32, #tpu.memory_space<vmem>>, vector<1x256xf32>
    %7 = vector.broadcast %6 : vector<1x256xf32> to vector<8x256xf32>
    %8 = arith.addf %5, %7 : vector<8x256xf32>
    %9 = math.tanh %8 : vector<8x256xf32>
    %c0_6 = arith.constant 0 : index
    %c0_7 = arith.constant 0 : index
    %10 = vector.load %arg13[%c0_6, %c0_7] : memref<8x256xf32, #tpu.memory_space<vmem>>, vector<8x256xf32>
    tpu.vector_store %arg13[%c0_6, %c0_7], %9 {strides = array<i32>} : memref<8x256xf32, #tpu.memory_space<vmem>>, vector<8x256xf32>,
    return
  }
  func.func @transform_0(%arg0: i32) -> (i32, i32) {
    %c0_i32 = arith.constant 0 : i32
    %c0_i32_0 = arith.constant 0 : i32
    %c0_i32_1 = arith.constant 0 : i32
    return %c0_i32, %c0_i32_0 : i32, i32
  }
  func.func @transform_1(%arg0: i32) -> (i32, i32) {
    %c0_i32 = arith.constant 0 : i32
    %c0_i32_0 = arith.constant 0 : i32
    %c0_i32_1 = arith.constant 0 : i32
    return %c0_i32, %c0_i32_0 : i32, i32
  }
  func.func @transform_2(%arg0: i32) -> (i32, i32) {
    %c0_i32 = arith.constant 0 : i32
    %c0_i32_0 = arith.constant 0 : i32
    %c0_i32_1 = arith.constant 0 : i32
    return %c0_i32, %c0_i32_0 : i32, i32
  }
  func.func @transform_3(%arg0: i32) -> (i32, i32) {
    %c0_i32 = arith.constant 0 : i32
    %c0_i32_0 = arith.constant 0 : i32
    %c0_i32_1 = arith.constant 0 : i32
    return %c0_i32, %c0_i32_0 : i32, i32
  }
  func.func @transform_4(%arg0: i32) -> (i32, i32) {
    %c0_i32 = arith.constant 0 : i32
    %c0_i32_0 = arith.constant 0 : i32
    %c0_i32_1 = arith.constant 0 : i32
    return %c0_i32, %c0_i32_0 : i32, i32
  }
  func.func @transform_5(%arg0: i32) -> (i32, i32) {
    %c0_i32 = arith.constant 0 : i32
    %c0_i32_0 = arith.constant 0 : i32
    %c0_i32_1 = arith.constant 0 : i32
    return %c0_i32, %c0_i32_0 : i32, i32
  }
  func.func @transform_6(%arg0: i32) -> (i32, i32) {
    %c0_i32 = arith.constant 0 : i32
    %c0_i32_0 = arith.constant 0 : i32
    %c0_i32_1 = arith.constant 0 : i32
    return %c0_i32, %c0_i32_0 : i32, i32
  }
  func.func @transform_7(%arg0: i32) -> (i32, i32) {
    %c0_i32 = arith.constant 0 : i32
    %c0_i32_0 = arith.constant 0 : i32
    %c0_i32_1 = arith.constant 0 : i32
    return %c0_i32, %c0_i32_0 : i32, i32
  }
  func.func @transform_8(%arg0: i32) -> (i32, i32) {
    %c0_i32 = arith.constant 0 : i32
    %c0_i32_0 = arith.constant 0 : i32
    %c0_i32_1 = arith.constant 0 : i32
    return %c0_i32, %c0_i32_0 : i32, i32
  }
  func.func @transform_9(%arg0: i32) -> (i32, i32) {
    %c0_i32 = arith.constant 0 : i32
    %c0_i32_0 = arith.constant 0 : i32
    %c0_i32_1 = arith.constant 0 : i32
    return %c0_i32, %c0_i32_0 : i32, i32
  }
  func.func @transform_10(%arg0: i32) -> (i32, i32) {
    %c0_i32 = arith.constant 0 : i32
    %c0_i32_0 = arith.constant 0 : i32
    return %c0_i32, %arg0 : i32, i32
  }
  func.func @transform_11(%arg0: i32) -> (i32, i32) {
    %c0_i32 = arith.constant 0 : i32
    %c0_i32_0 = arith.constant 0 : i32
    return %c0_i32, %arg0 : i32, i32
  }
  func.func @transform_12(%arg0: i32) -> (i32, i32) {
    %c0_i32 = arith.constant 0 : i32
    %c0_i32_0 = arith.constant 0 : i32
    return %c0_i32, %arg0 : i32, i32
  }
}

</mosaic_0001>

<bundles_post_ra>
// kernel: decoder_forward.1
= control target key start
LH: loop header
LB: loop body
LE: loop exit
PB: predicated region body
PF: predicated region fallthrough
CT: control target
= control target key end

     0   :  { %17 = vsyncpa [#allocation4], 0  ;;  %s848_s0 = inlined_call_operand.vmem [shape: f32[8,32], index: 0, kind: input, shape index: {}]   ;;  %s849_s1 = inlined_call_operand.vmem [shape: bf16[32,32], index: 1, kind: input, shape index: {}]   ;;  %s850_s2 = inlined_call_operand.hbm [shape: f32[1,32], index: 2, kind: input, shape index: {}]   ;;  %s851_s3 = inlined_call_operand.hbm [shape: f32[1,32], index: 3, kind: input, shape index: {}]   ;;  %s852_s4 = inlined_call_operand.vmem [shape: bf16[32,16], index: 4, kind: input, shape index: {}]   ;;  %s853_s5 = inlined_call_operand.vmem [shape: f32[1,16], index: 5, kind: input, shape index: {}]   ;;  %s854_s6 = inlined_call_operand.vmem [shape: f32[1,16], index: 6, kind: input, shape index: {}]   ;;  %s855_s7 = inlined_call_operand.hbm [shape: bf16[16,128], index: 7, kind: input, shape index: {}]   ;;  %s856_s8 = inlined_call_operand.vmem [shape: f32[1,128], index: 8, kind: input, shape index: {}]   ;;  %s857_s9 = inlined_call_operand.vmem [shape: f32[1,128], index: 9, kind: input, shape index: {}]   ;;  %s858_s10 = inlined_call_operand.hbm [shape: bf16[128,256], index: 10, kind: input, shape index: {}]   ;;  %s859_s11 = inlined_call_operand.vmem [shape: f32[1,256], index: 11, kind: input, shape index: {}]   ;;  %s860_s12 = inlined_call_operand.vmem [shape: f32[8,256], index: 12, kind: output, shape index: {}]  }
   0x1   :  { %18 = vsyncpa [#allocation6], 0  ;;  %s40_s23 = sshll.u32 %s851_s3, 4  ;;  %s41_s23 = int_to_ptr.hbm [resolvable:$true] %s40_s23 }
   0x2   :  { %19 = vsyncpa [#allocation9], 0  ;;  %s706_s24 = smov [#allocation5]   ;;  %s29_s28 = sshll.u32 %s850_s2, 4  ;;  %s30_s28 = int_to_ptr.hbm [resolvable:$true] %s29_s28 }
   0x3   :  { %s42_s25 = sshll.u32 %s706_s24, 4  ;;  %s707_s29 = smov [#allocation3]   ;;  %s43_s25 = int_to_ptr.vmem [resolvable:$true] %s42_s25 }
   0x4   :  { %45 = dma.hbm_to_vmem [thread:$0]  %s41_s23, 16, %s43_s25, [#allocation6]  }
   0x5   :  { %s31_s30 = sshll.u32 %s707_s29, 4  ;;  %s56_s15 = sshll.u32 %s855_s7, 4  ;;  %s32_s30 = int_to_ptr.vmem [resolvable:$true] %s31_s30  ;;  %s57_s15 = int_to_ptr.hbm [resolvable:$true] %s56_s15 }
   0x6   :  { %34 = dma.hbm_to_vmem [thread:$0]  %s30_s28, 16, %s32_s30, [#allocation4]  }
   0x7   :  { %s708_s3 = smov [#allocation7]   ;;  %s73_s19 = sshll.u32 %s858_s10, 4  ;;  %s74_s19 = int_to_ptr.hbm [resolvable:$true] %s73_s19 }
   0x8   :  { %s58_s16 = sshll.u32 %s708_s3, 4  ;;  %s709_s20 = smov 64   ;;  %s59_s16 = int_to_ptr.vmem [resolvable:$true] %s58_s16 }
   0x9   :  { %s710_s2 = smov 4   ;;  %s711_s21 = smov [#allocation8]  }
   0xa   :  { %64 = dma.hbm_to_vmem [thread:$0]  %s57_s15, 128, %s59_s16, [#allocation6], %s709_s20, %s709_s20, %s710_s2  }
   0xb   :  { %s75_s22 = sshll.u32 %s711_s21, 4  ;;  %s712_s23 = smov 128   ;;  %s76_s22 = int_to_ptr.vmem [resolvable:$true] %s75_s22 }
   0xc   :  { %s713_s24 = smov 8  }
   0xd   :  { %81 = dma.hbm_to_vmem [thread:$0]  %s74_s19, 2048, %s76_s22, [#allocation9], %s712_s23, %s712_s23, %s713_s24  }
   0xe   :  { %700 = dma.done.wait [#allocation4], 16  }
   0xf   :  { %701 = vsyncadd [#allocation4], 4294967280 }
  0x10   :  { %702 = dma.done.wait [#allocation6], 144  }
  0x11   :  { %703 = vsyncadd [#allocation6], 4294967152 }
  0x12   :  { %704 = dma.done.wait [#allocation9], 2048  }
  0x13   :  { %705 = vsyncadd [#allocation9], 4294965248  ;;  %v557_v0 = vld [vmem:[%s849_s1 + $0x8] sm:$0xff]  ;;  %v556_v1 = vld [vmem:[%s849_s1] sm:$0xff]  ;;  %vm123_vm0 = vcmask 261120   ;;  %v714_v4 = vmov 8.0  }
  0x14   :  { %v105_v2 = vld [vmem:[%s848_s0] sm:$0xff]  ;;  %133 = vmatpush.bf16.msra.mxu0 %v557_v0  ;;  %592 = vrcp.f32 %v714_v4  ;;  %v559_v26 = vld [vmem:[%s852_s4 + $0x8] sm:$0xff]  ;;  %vm223_vm5 = vcmask 130048  }
  0x15   :  { %v106_v3 = vpack.c.bf16 %v105_v2, %v105_v2  ;;  %214 = vmatpush.bf16.msra.mxu1 %v559_v26  ;;  %v558_v28 = vld [vmem:[%s852_s4] sm:$0xff]  ;;  %v576_v26 = vld [vmem:[#allocation8 + $0x74] sm:$0xf0] }
  0x16   :  { %v586_v40 = vld [vmem:[#allocation3] ss:$0 sm:$0xff]  ;;  %v587_v43 = vld [vmem:[#allocation5] ss:$0 sm:$0xff] }
  0x18   :  { %134 = vmatpush.bf16.msra.mxu0 %v556_v1  ;;  %v560_v1 = vld [vmem:[#allocation7] sm:$0xff] }
  0x19   :  { %215 = vmatpush.bf16.msra.mxu1 %v558_v28  ;;  %v575_v28 = vld [vmem:[#allocation8 + $0x74] sm:$0xf] }
  0x1a   :  { %v593_v5 = vpop.eup %592 }
  0x1b   :  { %477 = vmatmul.msk.bf16.vlgmr.msra.gmra.mxu0 %vm123_vm0, %v106_v3  ;;  %v150_v6 = vmul.f32 8.0, %v593_v5  ;;  %vm154_vm1 = vweird.f32 %v593_v5 }
  0x1c   :  { %282 = vmatpush.bf16.msrb.mxu0 %v560_v1 }
  0x1d   :  { %v151_v7 = vsub.f32 1.0, %v150_v6 }
  0x1f   :  { %v152_v11 = vmul.f32 %v593_v5, %v151_v7 }
  0x21   :  { %v153_v14 = vadd.f32 %v593_v5, %v152_v11 }
  0x23   :  { %v803_v18 = vsel %vm154_vm1, %v593_v5, %v153_v14 }
  0x98   :  { %v136_v8 = vpop.f32.mrf.mxu0 }
  0x99   :  { %v142_v9 = vsel %vm123_vm0, %v136_v8, 0.0 }
  0x9a   :  { %v143_v10 = vrot.slane %v142_v9, 4 }
  0x9c   :  { %v144_v12 = vadd.f32 %v143_v10, %v142_v9 }
  0x9e   :  { %v145_v13 = vrot.slane %v144_v12, 2 }
  0xa0   :  { %v146_v15 = vadd.f32 %v145_v13, %v144_v12  ;;  %v138_v16 = vpop.f32.mrf.mxu0  ;;  %v588_v12 = vld [vmem:[%s853_s5] ss:$0 sm:$0xff] }
  0xa2   :  { %v147_v17 = vrot.slane %v146_v15, 1 }
  0xa4   :  { %v148_v19 = vadd.f32 %v147_v17, %v146_v15  ;;  %v589_v15 = vld [vmem:[%s854_s6] ss:$0 sm:$0xff] }
  0xa6   :  { %v156_v20 = vmul.f32 %v803_v18, %v148_v19 }
  0xa8   :  { %v157_v21 = vsub.f32 %v136_v8, %v156_v20 }
  0xaa   :  { %v158_v22 = vmul.f32 %v157_v21, %v157_v21 }
  0xac   :  { %v159_v23 = vsel %vm123_vm0, %v158_v22, 0.0 }
  0xad   :  { %v160_v24 = vrot.slane %v159_v23, 4 }
  0xaf   :  { %v161_v25 = vadd.f32 %v160_v24, %v159_v23 }
  0xb1   :  { %v162_v27 = vrot.slane %v161_v25, 2 }
  0xb3   :  { %v163_v29 = vadd.f32 %v162_v27, %v161_v25  ;;  %v550_v25 = vld [vmem:[#allocation8 + $0x70] sm:$0xf] }
  0xb4   :  { %v551_v27 = vor.u32 %v576_v26, %v550_v25 }
  0xb5   :  { %v164_v30 = vrot.slane %v163_v29, 1 }
  0xb6   :  { %432 = vmatpush.bf16.msra.mxu3 %v551_v27 }
  0xb7   :  { %v165_v31 = vadd.f32 %v164_v30, %v163_v29  ;;  %v552_v29 = vld [vmem:[#allocation8 + $0x78] sm:$0xf0] }
  0xb9   :  { %v166_v32 = vmul.f32 %v165_v31, %v803_v18  ;;  %v555_v31 = vor.u32 %v575_v28, %v552_v29 }
  0xbb   :  { %v167_v33 = vadd.f32 1e-05, %v166_v32  ;;  %445 = vmatpush.bf16.msra.mxu2 %v555_v31 }
  0xbd   :  { %594 = vrsqrt.f32 %v167_v33  ;;  %vm174_vm3 = vweird.f32 %v167_v33 }
  0xc3   :  { %v595_v34 = vpop.eup %594 }
  0xc4   :  { %v169_v35 = vmul.f32 %v595_v34, %v167_v33  ;;  %vm175_vm2 = vweird.f32 %v595_v34 }
  0xc5   :  { %vm176_vm4 = vmor %vm174_vm3, %vm175_vm2 }
  0xc6   :  { %v170_v36 = vmul.f32 %v595_v34, %v169_v35  ;;  %v574_v35 = vld [vmem:[#allocation8 + $0x64] sm:$0xf0] }
  0xc8   :  { %v171_v37 = vmul.f32 0.5, %v170_v36 }
  0xca   :  { %v172_v38 = vsub.f32 1.5, %v171_v37  ;;  %v573_v37 = vld [vmem:[#allocation8 + $0x64] sm:$0xf] }
  0xcc   :  { %v173_v39 = vmul.f32 %v595_v34, %v172_v38  ;;  %v544_v38 = vld [vmem:[#allocation8 + $0x68] sm:$0xf0] }
  0xce   :  { %v177_v41 = vsel %vm176_vm4, %v595_v34, %v173_v39  ;;  %v542_v34 = vld [vmem:[#allocation8 + $0x60] sm:$0xf] }
  0xcf   :  { %v178_v42 = vmul.f32 %v177_v41, %v157_v21  ;;  %v543_v36 = vor.u32 %v574_v35, %v542_v34 }
  0xd1   :  { %v182_v44 = vmul.f32 %v586_v40, %v178_v42  ;;  %v547_v40 = vor.u32 %v573_v37, %v544_v38  ;;  %433 = vmatpush.bf16.msra.mxu3 %v543_v36  ;;  %v534_v42 = vld [vmem:[#allocation8 + $0x50] sm:$0xf] }
  0xd3   :  { %v186_v45 = vadd.f32 %v587_v43, %v182_v44  ;;  %446 = vmatpush.bf16.msra.mxu2 %v547_v40  ;;  %v572_v43 = vld [vmem:[#allocation8 + $0x54] sm:$0xf0]  ;;  %v571_v44 = vld [vmem:[#allocation8 + $0x54] sm:$0xf] }
  0xd5   :  { %v187_v46 = vmax.f32 %v186_v45, 0.0  ;;  %v535_v45 = vor.u32 %v572_v43, %v534_v42 }
  0xd7   :  { %v188_v47 = vpack.c.bf16 %v187_v46, %v187_v46  ;;  %v536_v46 = vld [vmem:[#allocation8 + $0x58] sm:$0xf0]  ;;  %434 = vmatpush.bf16.msra.mxu3 %v535_v45 }
  0xd9   :  { %486 = vmatmul.msk.bf16.vlgmr.msra.gmra.mxu1 %vm123_vm0, %v188_v47 }
 0x156   :  { %v217_v48 = vpop.f32.mrf.mxu1 }
 0x157   :  { %v224_v49 = vsel %vm223_vm5, %v217_v48, 0.0 }
 0x158   :  { %v225_v50 = vrot.slane %v224_v49, 4 }
 0x15a   :  { %v226_v51 = vadd.f32 %v225_v50, %v224_v49  ;;  %v526_v50 = vld [vmem:[#allocation8 + $0x40] sm:$0xf] }
 0x15c   :  { %v227_v52 = vrot.slane %v226_v51, 2 }
 0x15e   :  { %v228_v53 = vadd.f32 %v227_v52, %v226_v51  ;;  %v219_v54 = vpop.f32.mrf.mxu1  ;;  %v570_v51 = vld [vmem:[#allocation8 + $0x44] sm:$0xf0]  ;;  %v569_v52 = vld [vmem:[#allocation8 + $0x44] sm:$0xf] }
 0x15f   :  { %v528_v54 = vld [vmem:[#allocation8 + $0x48] sm:$0xf0] }
 0x160   :  { %v229_v55 = vrot.slane %v228_v53, 1 }
 0x162   :  { %v230_v56 = vadd.f32 %v229_v55, %v228_v53  ;;  %v527_v53 = vor.u32 %v570_v51, %v526_v50 }
 0x164   :  { %v231_v57 = vmul.f32 %v230_v56, %v803_v18  ;;  %v531_v56 = vor.u32 %v569_v52, %v528_v54  ;;  %435 = vmatpush.bf16.msra.mxu3 %v527_v53 }
 0x166   :  { %v232_v58 = vsub.f32 %v217_v48, %v231_v57  ;;  %v539_v48 = vor.u32 %v571_v44, %v536_v46 }
 0x168   :  { %v233_v59 = vmul.f32 %v232_v58, %v232_v58  ;;  %447 = vmatpush.bf16.msra.mxu2 %v539_v48 }
 0x16a   :  { %v234_v60 = vsel %vm223_vm5, %v233_v59, 0.0  ;;  %v568_v59 = vld [vmem:[#allocation8 + $0x34] sm:$0xf0] }
 0x16b   :  { %v235_v61 = vrot.slane %v234_v60, 4 }
 0x16c   :  { %448 = vmatpush.bf16.msra.mxu2 %v531_v56 }
 0x16d   :  { %v236_v62 = vadd.f32 %v235_v61, %v234_v60  ;;  %v567_v61 = vld [vmem:[#allocation8 + $0x34] sm:$0xf] }
 0x16f   :  { %v237_v63 = vrot.slane %v236_v62, 2 }
 0x171   :  { %v238_v0 = vadd.f32 %v237_v63, %v236_v62  ;;  %v520_v62 = vld [vmem:[#allocation8 + $0x38] sm:$0xf0] }
 0x173   :  { %v239_v2 = vrot.slane %v238_v0, 1 }
 0x175   :  { %v240_v3 = vadd.f32 %v239_v2, %v238_v0  ;;  %v523_v0 = vor.u32 %v567_v61, %v520_v62  ;;  %v510_v2 = vld [vmem:[#allocation8 + $0x20] sm:$0xf] }
 0x177   :  { %v241_v4 = vmul.f32 %v240_v3, %v803_v18  ;;  %449 = vmatpush.bf16.msra.mxu2 %v523_v0  ;;  %v566_v3 = vld [vmem:[#allocation8 + $0x24] sm:$0xf0] }
 0x179   :  { %v242_v5 = vadd.f32 1e-05, %v241_v4  ;;  %v565_v4 = vld [vmem:[#allocation8 + $0x24] sm:$0xf] }
 0x17b   :  { %596 = vrsqrt.f32 %v242_v5  ;;  %vm249_vm7 = vweird.f32 %v242_v5 }
 0x181   :  { %v597_v6 = vpop.eup %596 }
 0x182   :  { %v244_v7 = vmul.f32 %v597_v6, %v242_v5  ;;  %vm250_vm6 = vweird.f32 %v597_v6  ;;  %v511_v5 = vor.u32 %v566_v3, %v510_v2 }
 0x183   :  { %vm251_vm8 = vmor %vm249_vm7, %vm250_vm6 }
 0x184   :  { %v245_v8 = vmul.f32 %v597_v6, %v244_v7 }
 0x186   :  { %v246_v9 = vmul.f32 0.5, %v245_v8 }
 0x188   :  { %v247_v10 = vsub.f32 1.5, %v246_v9 }
 0x18a   :  { %v248_v11 = vmul.f32 %v597_v6, %v247_v10  ;;  %v502_v10 = vld [vmem:[#allocation8 + $0x10] sm:$0xf] }
 0x18c   :  { %v252_v13 = vsel %vm251_vm8, %v597_v6, %v248_v11  ;;  %v512_v6 = vld [vmem:[#allocation8 + $0x28] sm:$0xf0]  ;;  %v564_v11 = vld [vmem:[#allocation8 + $0x14] sm:$0xf0] }
 0x18d   :  { %v253_v14 = vmul.f32 %v252_v13, %v232_v58  ;;  %v518_v58 = vld [vmem:[#allocation8 + $0x30] sm:$0xf]  ;;  %v515_v8 = vor.u32 %v565_v4, %v512_v6  ;;  %v503_v13 = vor.u32 %v564_v11, %v502_v10 }
 0x18e   :  { %v519_v60 = vor.u32 %v568_v59, %v518_v58 }
 0x18f   :  { %v257_v16 = vmul.f32 %v588_v12, %v253_v14  ;;  %450 = vmatpush.bf16.msra.mxu2 %v515_v8  ;;  %v563_v12 = vld [vmem:[#allocation8 + $0x14] sm:$0xf]  ;;  %v504_v14 = vld [vmem:[#allocation8 + $0x18] sm:$0xf0] }
 0x190   :  { %436 = vmatpush.bf16.msra.mxu3 %v519_v60 }
 0x191   :  { %v261_v17 = vadd.f32 %v589_v15, %v257_v16  ;;  %v507_v16 = vor.u32 %v563_v12, %v504_v14 }
 0x193   :  { %v262_v19 = vmax.f32 %v261_v17, 0.0  ;;  %v494_v17 = vld [vmem:[#allocation8] sm:$0xf]  ;;  %451 = vmatpush.bf16.msra.mxu2 %v507_v16 }
 0x194   :  { %437 = vmatpush.bf16.msra.mxu3 %v511_v5 }
 0x195   :  { %v263_v20 = vpack.c.bf16 %v262_v19, %v262_v19  ;;  %v562_v19 = vld [vmem:[#allocation8 + $0x4] sm:$0xf0] }
 0x197   :  { %491 = vmatmul.msk.bf16.vlgmr.msrb.gmra.mxu0 %vm223_vm5, %v263_v20  ;;  %v561_v20 = vld [vmem:[#allocation8 + $0x4] sm:$0xf] }
 0x198   :  { %438 = vmatpush.bf16.msra.mxu3 %v503_v13 }
 0x214   :  { %v284_v21 = vpop.f32.mrf.mxu0 }
 0x215   :  { %v290_v22 = vrot.slane %v284_v21, 4 }
 0x217   :  { %v291_v23 = vadd.f32 %v290_v22, %v284_v21  ;;  %v496_v22 = vld [vmem:[#allocation8 + $0x8] sm:$0xf0] }
 0x219   :  { %v292_v24 = vrot.slane %v291_v23, 2 }
 0x21b   :  { %v293_v30 = vadd.f32 %v292_v24, %v291_v23  ;;  %v499_v24 = vor.u32 %v561_v20, %v496_v22 }
 0x21c   :  { %v286_v32 = vpop.f32.mrf.mxu0 }
 0x21d   :  { %v294_v33 = vrot.slane %v293_v30, 1  ;;  %452 = vmatpush.bf16.msra.mxu2 %v499_v24 }
 0x21f   :  { %v295_v39 = vadd.f32 %v294_v33, %v293_v30  ;;  %v590_v30 = vld [vmem:[%s856_s8] ss:$0 sm:$0xff] }
 0x220   :  { %v591_v33 = vld [vmem:[%s857_s9] ss:$0 sm:$0xff] }
 0x221   :  { %v296_v41 = vmul.f32 %v295_v39, %v803_v18  ;;  %v346_v39 = vld [vmem:[%s859_s11] sm:$0x3] }
 0x222   :  { %v348_v40 = vperm.slane %v346_v39, 0 }
 0x223   :  { %v827_v47 = vsub.f32 %v284_v21, %v296_v41  ;;  %v495_v21 = vor.u32 %v562_v19, %v494_v17  ;;  %v349_v41 = vperm.slane %v346_v39, 1 }
 0x225   :  { %v298_v49 = vmul.f32 %v827_v47, %v827_v47  ;;  %439 = vmatpush.bf16.msra.mxu3 %v495_v21 }
 0x227   :  { %v299_v55 = vrot.slane %v298_v49, 4 }
 0x229   :  { %v300_v57 = vadd.f32 %v299_v55, %v298_v49 }
 0x22b   :  { %v301_v63 = vrot.slane %v300_v57, 2 }
 0x22d   :  { %v302_v1 = vadd.f32 %v301_v63, %v300_v57 }
 0x22f   :  { %v303_v7 = vrot.slane %v302_v1, 1 }
 0x231   :  { %v304_v9 = vadd.f32 %v303_v7, %v302_v1 }
 0x233   :  { %v305_v15 = vmul.f32 %v304_v9, %v803_v18 }
 0x235   :  { %v306_v23 = vadd.f32 1e-05, %v305_v15 }
 0x237   :  { %598 = vrsqrt.f32 %v306_v23  ;;  %vm313_vm10 = vweird.f32 %v306_v23 }
 0x23d   :  { %v599_v25 = vpop.eup %598 }
 0x23e   :  { %v308_v26 = vmul.f32 %v599_v25, %v306_v23  ;;  %vm314_vm9 = vweird.f32 %v599_v25 }
 0x23f   :  { %vm315_vm11 = vmor %vm313_vm10, %vm314_vm9 }
 0x240   :  { %v309_v27 = vmul.f32 %v599_v25, %v308_v26 }
 0x242   :  { %v310_v28 = vmul.f32 0.5, %v309_v27 }
 0x244   :  { %v311_v29 = vsub.f32 1.5, %v310_v28 }
 0x246   :  { %v312_v18 = vmul.f32 %v599_v25, %v311_v29 }
 0x248   :  { %v316_v31 = vsel %vm315_vm11, %v599_v25, %v312_v18 }
 0x249   :  { %v317_v32 = vmul.f32 %v316_v31, %v827_v47 }
 0x24b   :  { %v321_v34 = vmul.f32 %v590_v30, %v317_v32 }
 0x24d   :  { %v325_v35 = vadd.f32 %v591_v33, %v321_v34 }
 0x24f   :  { %v326_v36 = vmax.f32 %v325_v35, 0.0 }
 0x251   :  { %v327_v37 = vpack.c.bf16 %v326_v36, %v326_v36 }
 0x253   :  { %328 = vst [vmem:[#allocation2] sm:$0xf] %v327_v37 }
 0x25a   :  { %v329_v38 = vld [vmem:[#allocation2] sm:$0xf] }
 0x25b   :  { %440 = vmatmul.bf16.vlgmr.msra.gmra.mxu3 %v329_v38  ;;  %453 = vmatmul.bf16.vlgmr.msra.gmra.mxu2 %v329_v38 }
 0x2de   :  { %v441_v42 = vpop.f32.mrf.mxu3  ;;  %v454_v43 = vpop.f32.mrf.mxu2 }
 0x2df   :  { %v442_v44 = vadd.f32 %v441_v42, %v348_v40  ;;  %v455_v45 = vadd.f32 %v454_v43, %v349_v41 }
 0x2e1   :  { %600 = vtanh.f32 %v442_v44 }
 0x2e2   :  { %602 = vtanh.f32 %v455_v45 }
 0x2e6   :  { %v443_v46 = vpop.f32.mrf.mxu3  ;;  %v456_v47 = vpop.f32.mrf.mxu2 }
 0x2e7   :  { %v601_v48 = vpop.eup %600 }
 0x2e8   :  { %v603_v49 = vpop.eup %602  ;;  %460 = vst [vmem:[%s860_s12] sm:$0xff] %v601_v48 }
 0x2e9   :  { %461 = vst [vmem:[%s860_s12 + $0x8] sm:$0xff] %v603_v49 }
 0x2ea   :  { %466 = vsyncpa [#allocation4], 1 }
 0x2eb   :  { %467 = vsyncpa [#allocation6], 1 }
 0x2ec   :  { %468 = vsyncpa [#allocation9], 1 }

</bundles_post_ra>
